<compile_context>
chip_gen: v5e
topology: v5e:2x2
jax: 0.10.0
libtpu: 0.0.40
codegen_flags: <defaults>
</compile_context>

<pallas_src>
import functools

import jax
import jax.numpy as jnp
from jax.experimental import pallas as pl
from jax.experimental.pallas import tpu as pltpu


_VMEM_LIMIT_BYTES = 32 * 1024 * 1024  # safe scoped limit on v5e/v6e/v7x


def _tpu_info_attr(names, default):
    try:
        info = pltpu.get_tpu_info()
    except Exception:
        return default
    for name in names:
        val = getattr(info, name, None)
        if isinstance(val, int) and val > 0:
            return val
    return default


def _vmem_budget_bytes() -> int:
    """Working-set budget (2 inputs x 2 pipeline buffers + (8,C) acc).

    Keep it <= ~1/4 of physical VMEM so double-buffering always has headroom:
    v7x has only 64 MiB per TensorCore, v5e/v6e have 128 MiB.
    """
    phys = _tpu_info_attr(("vmem_capacity_bytes", "vmem_bytes"),
                          64 * 1024 * 1024)
    return max(8 * 1024 * 1024, min(phys // 4, 24 * 1024 * 1024))


def _num_tensorcores() -> int:
    """Best-effort TensorCore count (2 on v7x, 1 on v5e/v6e)."""
    return max(1, min(2, _tpu_info_attr(
        ("num_tensorcores", "tensorcores_per_chip", "num_cores",
         "cores_per_chip"), 1)))


def _row_alignment(itemsize: int) -> int:
    # Sub-32-bit dtypes pack along sublanes: bf16 -> 16 rows, int8/fp8 -> 32.
    return 8 * max(1, 4 // int(itemsize))


def _pick_tile_n(n: int, c: int, in_itemsize: int) -> int:
    align = _row_alignment(in_itemsize)
    n_pad = ((n + align - 1) // align) * align
    budget = _vmem_budget_bytes()
    # 4 input buffers (2 inputs x 2 pipeline buffers); (8, C) f32 acc is fixed.
    per_row_bytes = c * 4 * in_itemsize
    budget_rows = max(align, (budget - 8 * c * 4) // max(1, per_row_bytes))
    tile = min(n_pad, int(budget_rows))
    tile = max(align, (tile // align) * align)
    return tile


def _focal_loss_kernel(yp_ref, yt_ref, out_ref, acc_ref, *,
                       gamma: float, n_rows: int, steps_per_core: int,
                       total_tiles: int, num_core_splits: int,
                       binary_targets: bool):
    core = pl.program_id(0)
    step = pl.program_id(1)
    last_step = pl.num_programs(1) - 1
    tile_n, c = yp_ref.shape

    @pl.when(step == 0)
    def _init():
        acc_ref[...] = jnp.zeros_like(acc_ref)

    logical_tile = core * steps_per_core + step
    needs_mask = (n_rows % tile_n) != 0
    needs_gate = (num_core_splits * steps_per_core) != total_tiles

    def partial_sum(apply_mask: bool):
        p = yp_ref[...].astype(jnp.float32)
        t = yt_ref[...].astype(jnp.float32)

        # 1 - p_t = p + t*(1 - 2p)   (3 VALU ops instead of 6)
        one_minus_pt = p + t * (1.0 - 2.0 * p)

        if binary_targets:
            # t in {0,1}: bce = -log(p_t) with the same -100 clamp (one log).
            bce = -jnp.maximum(jnp.log(1.0 - one_minus_pt), -100.0)
        else:
            # BCELoss(reduction='none'), logs clamped at -100:
            # bce = -(log(1-p) + t*(log(p) - log(1-p)))   (one fewer multiply)
            log_p = jnp.maximum(jnp.log(p), -100.0)
            log_1mp = jnp.maximum(jnp.log(1.0 - p), -100.0)
            bce = -(log_1mp + t * (log_p - log_1mp))

        # (1 - p_t) ** gamma: gamma is static, branch at trace time.
        # Integer gamma -> repeated VPU multiplies (EUP stays free).
        if float(gamma).is_integer() and 0 <= int(gamma) <= 16:
            g = int(gamma)
            if g == 0:
                mod = jnp.ones_like(one_minus_pt)
            else:
                mod = one_minus_pt
                for _ in range(g - 1):
                    mod = mod * one_minus_pt
        else:
            mod = jnp.power(one_minus_pt, jnp.float32(gamma))

        focal = mod * bce

        if apply_mask:
            # Only the last logical tile can have padded rows; a where-select
            # blocks even NaN from the padding.
            row_ids = logical_tile * tile_n + jax.lax.broadcasted_iota(
                jnp.int32, focal.shape, 0)
            focal = jnp.where(row_ids < n_rows, focal, 0.0)

        # (tile_n, C) -> (tile_n//8, 8, C): vreg-layout-preserving reshape;
        # the leading-axis sum is pure per-vreg VPU adds (no cross-lane work).
        return focal.reshape(tile_n // 8, 8, c).sum(axis=0)

    if not needs_mask and not needs_gate:
        acc_ref[...] += partial_sum(False)
    elif needs_gate and not needs_mask:
        @pl.when(logical_tile < total_tiles)
        def _body():
            acc_ref[...] += partial_sum(False)
    else:
        # Mask only traced/applied on the last logical tile; clamped duplicate
        # tiles (logical_tile >= total_tiles) skip all compute.
        @pl.when(logical_tile < total_tiles - 1)
        def _body():
            acc_ref[...] += partial_sum(False)

        @pl.when(logical_tile == total_tiles - 1)
        def _tail():
            acc_ref[...] += partial_sum(True)

    # Single cross-lane reduction, once per core, on the last step.
    @pl.when(step == last_step)
    def _finalize():
        total = jnp.sum(acc_ref[...])
        # Broadcast to the whole (8, 128) block -> lane-dense unmasked store.
        out_ref[...] = jnp.full(out_ref.shape, total, dtype=out_ref.dtype)


def focal_loss(y_pred: jax.Array, y_true: jax.Array,
               alpha: float = 0.1, gamma: float = 2.0,
               tile_n: int | None = None,
               num_core_splits: int | None = None,
               assume_binary_targets: bool = False) -> jax.Array:
    del alpha  # unused in the reference forward pass
    assert y_pred.shape == y_true.shape and y_pred.ndim == 2
    n, c = y_pred.shape
    itemsize = jnp.dtype(y_pred.dtype).itemsize
    align = _row_alignment(itemsize)

    if tile_n is None:
        tile_n = _pick_tile_n(n, c, itemsize)
    assert tile_n % align == 0, (
        f"tile_n={tile_n} must be a multiple of {align} for dtype "
        f"{y_pred.dtype}")

    total_tiles = pl.cdiv(n, tile_n)
    if num_core_splits is None:
        num_core_splits = _num_tensorcores()
    num_core_splits = max(1, min(int(num_core_splits), total_tiles))
    steps_per_core = pl.cdiv(total_tiles, num_core_splits)

    def in_map(core, step):
        # Clamp out-of-range tiles of the core split to a valid block; their
        # contribution is skipped inside the kernel via pl.when.
        tile_idx = core * steps_per_core + step
        return (jnp.minimum(tile_idx, total_tiles - 1), 0)

    kernel = functools.partial(
        _focal_loss_kernel, gamma=gamma, n_rows=n,
        steps_per_core=steps_per_core, total_tiles=total_tiles,
        num_core_splits=num_core_splits, binary_targets=assume_binary_targets)

    # One (8, 128) partial-sum block per core split (tile-aligned output).
    out = pl.pallas_call(
        kernel,
        out_shape=jax.ShapeDtypeStruct((num_core_splits * 8, 128), jnp.float32),
        grid_spec=pltpu.PrefetchScalarGridSpec(
            num_scalar_prefetch=0,
            grid=(num_core_splits, steps_per_core),
            in_specs=[
                pl.BlockSpec((tile_n, c), in_map),
                pl.BlockSpec((tile_n, c), in_map),
            ],
            out_specs=pl.BlockSpec((8, 128), lambda core, step: (core, 0)),
            scratch_shapes=[pltpu.VMEM((8, c), jnp.float32)],
        ),
        compiler_params=pltpu.CompilerParams(
            dimension_semantics=("parallel", "arbitrary"),
            vmem_limit_bytes=_VMEM_LIMIT_BYTES),
    )(y_pred, y_true)

    # Each (8,128) block holds its core's partial sum; take one element per
    # core, add the partials, apply the 2/N scale (= 2 * mean(sum(dim=1))).
    partials = out[0::8, 0]
    return (2.0 / float(n)) * jnp.sum(partials)


def _focal_loss_ref(y_pred, y_true, gamma=2.0):
    p = y_pred.astype(jnp.float32)
    t = y_true.astype(jnp.float32)
    bce = -(t * jnp.maximum(jnp.log(p), -100.0)
            + (1.0 - t) * jnp.maximum(jnp.log(1.0 - p), -100.0))
    p_t = t * p + (1.0 - t) * (1.0 - p)
    focal = jnp.power(1.0 - p_t, gamma) * bce
    return 2.0 * jnp.mean(jnp.sum(focal, axis=1))


if __name__ == "__main__":
    key = jax.random.PRNGKey(0)
    k1, k2, k3, k4, k5, k6 = jax.random.split(key, 6)

    # Primary small multi-label problem: batch=8, 128 labels (f32, single tile).
    N, C = 8, 128
    y_pred = jax.nn.sigmoid(jax.random.normal(k1, (N, C), dtype=jnp.float32))
    y_true = (jax.random.uniform(k2, (N, C)) < 0.2).astype(jnp.float32)

    out = jax.block_until_ready(focal_loss(y_pred, y_true, alpha=0.1, gamma=2.0))
    ref = _focal_loss_ref(y_pred, y_true, gamma=2.0)
    assert jnp.allclose(out, ref, rtol=1e-5, atol=1e-5), (out, ref)

    # Secondary check: N not a multiple of the tile (row masking), multi-step
    # accumulation grid, forced 2-way core split with a clamped duplicate tile.
    N2, C2 = 37, 256
    y_pred2 = jax.nn.sigmoid(jax.random.normal(k3, (N2, C2), dtype=jnp.float32))
    y_true2 = (jax.random.uniform(k4, (N2, C2)) < 0.2).astype(jnp.float32)
    out2 = jax.block_until_ready(
        focal_loss(y_pred2, y_true2, gamma=2.0, tile_n=8, num_core_splits=2))
    ref2 = _focal_loss_ref(y_pred2, y_true2, gamma=2.0)
    assert jnp.allclose(out2, ref2, rtol=1e-5, atol=1e-4), (out2, ref2)

    # Third check: bf16 input path (sublane alignment 16) + binary-target
    # single-log fast path.
    N3, C3 = 48, 128
    y_pred3 = jax.nn.sigmoid(
        jax.random.normal(k5, (N3, C3), dtype=jnp.float32)).astype(jnp.bfloat16)
    y_true3 = (jax.random.uniform(k6, (N3, C3)) < 0.2).astype(jnp.bfloat16)
    out3 = jax.block_until_ready(
        focal_loss(y_pred3, y_true3, gamma=2.0, assume_binary_targets=True))
    ref3 = _focal_loss_ref(y_pred3, y_true3, gamma=2.0)
    assert jnp.allclose(out3, ref3, rtol=1e-4, atol=1e-3), (out3, ref3)

    print("KERNEL_OK")
</pallas_src>

<mosaic_0001>
module attributes {stable_mosaic.version = 11 : i64} {
  func.func @_focal_loss_kernel(%arg0: i32, %arg1: i32, %arg2: memref<8x128xf32, #tpu.memory_space<vmem>>, %arg3: memref<8x128xf32, #tpu.memory_space<vmem>>, %arg4: memref<8x128xf32, #tpu.memory_space<vmem>>, %arg5: memref<8x128xf32, #tpu.memory_space<vmem>>) attributes {dimension_semantics = [#tpu.dimension_semantics<parallel>, #tpu.dimension_semantics<arbitrary>], iteration_bounds = array<i64: 1, 1>, scalar_prefetch = 0 : i64, scratch_operands = 1 : i64, tpu.core_type = #tpu.core_type<tc>, window_params = [{transform_indices = @transform_0, window_bounds = array<i64: 8, 128>}, {transform_indices = @transform_1, window_bounds = array<i64: 8, 128>}, {transform_indices = @transform_2, window_bounds = array<i64: 8, 128>}]} {
    %c0_i32 = arith.constant 0 : i32
    %0 = arith.cmpi eq, %arg1, %c0_i32 : i32
    %1 = arith.extui %0 : i1 to i32
    %c0_i32_0 = arith.constant 0 : i32
    %2 = arith.cmpi ne, %1, %c0_i32_0 : i32
    scf.if %2 {
      %cst_16 = arith.constant 0.000000e+00 : f32
      %34 = vector.broadcast %cst_16 : f32 to vector<8x128xf32>
      %c0_17 = arith.constant 0 : index
      %c0_18 = arith.constant 0 : index
      %35 = vector.load %arg5[%c0_17, %c0_18] : memref<8x128xf32, #tpu.memory_space<vmem>>, vector<8x128xf32>
      tpu.vector_store %arg5[%c0_17, %c0_18], %34 {strides = array<i32>} : memref<8x128xf32, #tpu.memory_space<vmem>>, vector<8x128xf32>,
    } else {
    }
    %c0 = arith.constant 0 : index
    %c0_1 = arith.constant 0 : index
    %3 = vector.load %arg5[%c0, %c0_1] : memref<8x128xf32, #tpu.memory_space<vmem>>, vector<8x128xf32>
    %c0_2 = arith.constant 0 : index
    %c0_3 = arith.constant 0 : index
    %4 = vector.load %arg2[%c0_2, %c0_3] : memref<8x128xf32, #tpu.memory_space<vmem>>, vector<8x128xf32>
    %c0_4 = arith.constant 0 : index
    %c0_5 = arith.constant 0 : index
    %5 = vector.load %arg3[%c0_4, %c0_5] : memref<8x128xf32, #tpu.memory_space<vmem>>, vector<8x128xf32>
    %cst = arith.constant 2.000000e+00 : f32
    %6 = vector.broadcast %cst : f32 to vector<8x128xf32>
    %7 = arith.mulf %6, %4 : vector<8x128xf32>
    %cst_6 = arith.constant 1.000000e+00 : f32
    %8 = vector.broadcast %cst_6 : f32 to vector<8x128xf32>
    %9 = arith.subf %8, %7 : vector<8x128xf32>
    %10 = arith.mulf %5, %9 : vector<8x128xf32>
    %11 = arith.addf %4, %10 : vector<8x128xf32>
    %12 = math.log %4 : vector<8x128xf32>
    %cst_7 = arith.constant -1.000000e+02 : f32
    %13 = vector.broadcast %cst_7 : f32 to vector<8x128xf32>
    %14 = arith.maximumf %12, %13 : vector<8x128xf32>
    %cst_8 = arith.constant 1.000000e+00 : f32
    %15 = vector.broadcast %cst_8 : f32 to vector<8x128xf32>
    %16 = arith.subf %15, %4 : vector<8x128xf32>
    %17 = math.log %16 : vector<8x128xf32>
    %cst_9 = arith.constant -1.000000e+02 : f32
    %18 = vector.broadcast %cst_9 : f32 to vector<8x128xf32>
    %19 = arith.maximumf %17, %18 : vector<8x128xf32>
    %20 = arith.subf %14, %19 : vector<8x128xf32>
    %21 = arith.mulf %5, %20 : vector<8x128xf32>
    %22 = arith.addf %19, %21 : vector<8x128xf32>
    %cst_10 = arith.constant 0.000000e+00 : f32
    %23 = vector.broadcast %cst_10 : f32 to vector<8x128xf32>
    %24 = arith.subf %23, %22 : vector<8x128xf32>
    %25 = arith.mulf %11, %11 : vector<8x128xf32>
    %26 = arith.mulf %25, %24 : vector<8x128xf32>
    %27 = vector.shape_cast %26 : vector<8x128xf32> to vector<1x8x128xf32>
    %cst_11 = arith.constant dense<0.000000e+00> : vector<8x128xf32>
    %28 = vector.multi_reduction <add>, %27, %cst_11 [0] : vector<1x8x128xf32> to vector<8x128xf32>
    %29 = arith.addf %3, %28 : vector<8x128xf32>
    %c0_12 = arith.constant 0 : index
    %c0_13 = arith.constant 0 : index
    %30 = vector.load %arg5[%c0_12, %c0_13] : memref<8x128xf32, #tpu.memory_space<vmem>>, vector<8x128xf32>
    tpu.vector_store %arg5[%c0_12, %c0_13], %29 {strides = array<i32>} : memref<8x128xf32, #tpu.memory_space<vmem>>, vector<8x128xf32>,
    %c0_i32_14 = arith.constant 0 : i32
    %31 = arith.cmpi eq, %arg1, %c0_i32_14 : i32
    %32 = arith.extui %31 : i1 to i32
    %c0_i32_15 = arith.constant 0 : i32
    %33 = arith.cmpi ne, %32, %c0_i32_15 : i32
    scf.if %33 {
      %c0_16 = arith.constant 0 : index
      %c0_17 = arith.constant 0 : index
      %34 = vector.load %arg5[%c0_16, %c0_17] : memref<8x128xf32, #tpu.memory_space<vmem>>, vector<8x128xf32>
      %35 = vector.shape_cast %34 : vector<8x128xf32> to vector<1x8x128xf32>
      %cst_18 = arith.constant dense<0.000000e+00> : vector<1xf32>
      %36 = vector.multi_reduction <add>, %35, %cst_18 [1, 2] : vector<1x8x128xf32> to vector<1xf32>
      %37 = vector.shape_cast %36 : vector<1xf32> to vector<1x1x1xf32>
      %38 = vector.extract %37[0, 0, 0] : f32 from vector<1x1x1xf32>
      %39 = vector.broadcast %38 : f32 to vector<8x128xf32>
      %c0_19 = arith.constant 0 : index
      %c0_20 = arith.constant 0 : index
      %40 = vector.load %arg4[%c0_19, %c0_20] : memref<8x128xf32, #tpu.memory_space<vmem>>, vector<8x128xf32>
      tpu.vector_store %arg4[%c0_19, %c0_20], %39 {strides = array<i32>} : memref<8x128xf32, #tpu.memory_space<vmem>>, vector<8x128xf32>,
    } else {
    }
    return
  }
  func.func @transform_0(%arg0: i32, %arg1: i32) -> (i32, i32) {
    %c1_i32 = arith.constant 1 : i32
    %0 = arith.muli %arg0, %c1_i32 : i32
    %1 = arith.addi %0, %arg1 : i32
    %c0_i32 = arith.constant 0 : i32
    %2 = arith.minsi %1, %c0_i32 : i32
    %c0_i32_0 = arith.constant 0 : i32
    %c0_i32_1 = arith.constant 0 : i32
    return %2, %c0_i32_0 : i32, i32
  }
  func.func @transform_1(%arg0: i32, %arg1: i32) -> (i32, i32) {
    %c1_i32 = arith.constant 1 : i32
    %0 = arith.muli %arg0, %c1_i32 : i32
    %1 = arith.addi %0, %arg1 : i32
    %c0_i32 = arith.constant 0 : i32
    %2 = arith.minsi %1, %c0_i32 : i32
    %c0_i32_0 = arith.constant 0 : i32
    %c0_i32_1 = arith.constant 0 : i32
    return %2, %c0_i32_0 : i32, i32
  }
  func.func @transform_2(%arg0: i32, %arg1: i32) -> (i32, i32) {
    %c0_i32 = arith.constant 0 : i32
    %c0_i32_0 = arith.constant 0 : i32
    return %arg0, %c0_i32 : i32, i32
  }
}

</mosaic_0001>

<bundles_post_ra>
// kernel: tpu_custom_call.1
= control target key start
LH: loop header
LB: loop body
LE: loop exit
PB: predicated region body
PF: predicated region fallthrough
CT: control target
= control target key end

     0   :  { %7 = vsyncpa [#allocation4], 0  ;;  %s235_s0 = inlined_call_operand.hbm [shape: f32[8,128], index: 0, kind: input, shape index: {}]   ;;  %s236_s1 = inlined_call_operand.hbm [shape: f32[8,128], index: 1, kind: input, shape index: {}]   ;;  %s237_s2 = inlined_call_operand.hbm [shape: f32[8,128], index: 2, kind: output, shape index: {}]  }
   0x1   :  { %8 = vsyncpa [#allocation7], 0 }
   0x2   :  { %9 = vsyncpa [#allocation5], 0  ;;  %s20_s11 = sshll.u32 %s235_s0, 4  ;;  %s208_s12 = smov [#allocation3]   ;;  %s21_s11 = int_to_ptr.hbm [resolvable:$true] %s20_s11 }
   0x3   :  { %s22_s13 = sshll.u32 %s208_s12, 4  ;;  %s36_s16 = sshll.u32 %s236_s1, 4  ;;  %s23_s13 = int_to_ptr.vmem [resolvable:$true] %s22_s13  ;;  %s37_s16 = int_to_ptr.hbm [resolvable:$true] %s36_s16 }
   0x4   :  { %25 = dma.hbm_to_vmem [thread:$0]  %s21_s11, 128, %s23_s13, [#allocation4]  }
   0x5   :  { %s209_s17 = smov [#allocation6]  }
   0x6   :  { %s38_s18 = sshll.u32 %s209_s17, 4  ;;  %s39_s18 = int_to_ptr.vmem [resolvable:$true] %s38_s18 }
   0x7   :  { %41 = dma.hbm_to_vmem [thread:$0]  %s37_s16, 128, %s39_s18, [#allocation7]  }
   0x8   :  { %202 = dma.done.wait [#allocation4], 128  }
   0x9   :  { %203 = vsyncadd [#allocation4], 4294967168 }
   0xa   :  { %204 = dma.done.wait [#allocation7], 128  }
   0xb   :  { %205 = vsyncadd [#allocation7], 4294967168  ;;  %v62_v0 = vld [vmem:[#allocation3] sm:$0xff]  ;;  %v63_v5 = vld [vmem:[#allocation6] sm:$0xff]  ;;  %s210_s0 = smov [#allocation8]   ;;  %s106_s21 = sshll.u32 %s237_s2, 4  ;;  %s107_s21 = int_to_ptr.hbm [resolvable:$true] %s106_s21 }
   0xc   :  { %126 = vlog2.f32 %v62_v0  ;;  %v71_v1 = vsub.f32 1.0, %v62_v0  ;;  %v64_v2 = vmul.f32 2.0, %v62_v0  ;;  %s104_s1 = sshll.u32 %s210_s0, 4  ;;  %s105_s1 = int_to_ptr.vmem [resolvable:$true] %s104_s1 }
   0xe   :  { %128 = vlog2.f32 %v71_v1  ;;  %v65_v3 = vsub.f32 1.0, %v64_v2 }
  0x10   :  { %v66_v8 = vmul.f32 %v65_v3, %v63_v5 }
  0x12   :  { %v127_v4 = vpop.eup %126  ;;  %v67_v12 = vadd.f32 %v66_v8, %v62_v0 }
  0x13   :  { %v69_v6 = vmul.f32 0.6931472, %v127_v4 }
  0x14   :  { %v129_v7 = vpop.eup %128  ;;  %v79_v16 = vmul.f32 %v67_v12, %v67_v12 }
  0x15   :  { %v70_v9 = vmax.f32 %v69_v6, -100.0  ;;  %v73_v10 = vmul.f32 0.6931472, %v129_v7 }
  0x17   :  { %v74_v11 = vmax.f32 %v73_v10, -100.0 }
  0x19   :  { %v75_v13 = vsub.f32 %v70_v9, %v74_v11 }
  0x1b   :  { %v76_v14 = vmul.f32 %v75_v13, %v63_v5 }
  0x1d   :  { %v77_v15 = vadd.f32 %v76_v14, %v74_v11 }
  0x1f   :  { %v78_v17 = vsub.f32 0.0, %v77_v15 }
  0x21   :  { %v80_v18 = vmul.f32 %v79_v16, %v78_v17 }
  0x23   :  { %88 = vadd.xlane.f32.xlu0 %v80_v18 }
  0x96   :  { %v89_v19 = vpop.xlane.xlu0 %88 }
  0x97   :  { %v90_v20 = vrot.slane %v89_v19, 4 }
  0x99   :  { %v91_v21 = vadd.f32 %v90_v20, %v89_v19 }
  0x9b   :  { %v92_v22 = vrot.slane %v91_v21, 2 }
  0x9d   :  { %v93_v23 = vadd.f32 %v92_v22, %v91_v21 }
  0x9f   :  { %v94_v24 = vrot.slane %v93_v23, 1 }
  0xa1   :  { %v95_v25 = vadd.f32 %v94_v24, %v93_v23 }
  0xa3   :  { %121 = vpush %v95_v25 }
  0xd4   :  { %s122_s22 = spop %121 }
  0xd5   :  { %v97_v26 = vstv %s122_s22 }
  0xd6   :  { %98 = vst [vmem:[#allocation8] sm:$0xff] %v97_v26 }
  0xd7   :  { %109 = dma.vmem_to_hbm [thread:$0]  %s105_s1, 128, %s107_s21, [#allocation5]  }
  0xd8   :  { %206 = dma.done.wait [#allocation5], 128  }
  0xd9   :  { %207 = vsyncadd [#allocation5], 4294967168 }
  0xda   :  { %114 = vsyncpa [#allocation4], 1 }
  0xdb   :  { %115 = vsyncpa [#allocation7], 1 }
  0xdc   :  { %116 = vsyncpa [#allocation5], 1 }

</bundles_post_ra>
